<compile_context>
chip_gen: v7x
topology: tpu7x:2x2x1
jax: 0.10.0
libtpu: 0.0.40
codegen_flags: <defaults>
</compile_context>

<pallas_src>
import jax
import jax.numpy as jnp
from jax.experimental import pallas as pl
from jax.experimental.pallas import tpu as pltpu

_LANES = 128
_SPLIT_MIN_ROWS = 1024   # below this, splitting for megacore only adds overhead


def _derive_limits():
    """Per-generation VMEM budget: compiler limit + max block bytes."""
    try:
        cap = int(pltpu.get_tpu_info().vmem_capacity_bytes)
    except Exception:
        cap = 64 * 1024 * 1024          # conservative fallback: v7x per-TC VMEM
    if cap <= 64 * 1024 * 1024:         # v7x (64 MiB / TC)
        vmem_limit = 40 * 1024 * 1024
    else:                               # v5e / v6e (128 MiB)
        vmem_limit = 64 * 1024 * 1024
    # 2 arrays (in + out) x 2 pipeline buffers, plus slack for misc scratch.
    max_block_bytes = min(8 * 1024 * 1024, (vmem_limit - 4 * 1024 * 1024) // 4)
    return vmem_limit, max_block_bytes


_VMEM_LIMIT_BYTES, _MAX_BLOCK_BYTES = _derive_limits()


def _dropout_kernel(seed_ref, thr_ref, scale_ref, x_ref, o_ref):
    block_rows, lanes = x_ref.shape   # lanes == 128
    blk = pl.program_id(0)

    # Global flat element index: idx = (blk*block_rows + row) * 128 + col,
    # built with one broadcast add + shift + or.
    # TODO(synk): uint32 index wraps for tensors >= 2^32 elements; mix high
    # row bits into the seed if such sizes ever matter (irrelevant here).
    row0 = blk.astype(jnp.uint32) * jnp.uint32(block_rows)
    rows = row0 + jax.lax.broadcasted_iota(jnp.uint32, (block_rows, lanes), 0)
    cols = jax.lax.broadcasted_iota(jnp.uint32, (block_rows, lanes), 1)
    idx = (rows << 7) | cols

    # Stateless hash of (idx, seed): trimmed lowbias32 (two multiply rounds).
    # Deterministic per seed and independent of the tiling/grid.
    seed_mix = seed_ref[0].astype(jnp.uint32) * jnp.uint32(0x9E3779B9)  # scalar
    h = idx ^ seed_mix
    h = h * jnp.uint32(0x7FEB352D)
    h = h ^ (h >> 15)
    h = h * jnp.uint32(0x846CA68B)
    h = h ^ (h >> 16)

    # Integer threshold on the top 24 bits: P(keep) = 1 - p.
    thr = thr_ref[0].astype(jnp.uint32)         # round(p * 2^24)
    keep = (h >> 8) >= thr

    x = x_ref[...]                              # native dtype, no f32 round-trip
    scale = scale_ref[0].astype(x.dtype)        # 1/(1-p), or 0 when p == 1
    o_ref[...] = jnp.where(keep, x * scale, jnp.zeros_like(x))


@jax.jit
def _fixed_dropout_impl(x, p, seed):
    orig_shape = x.shape
    orig_dtype = x.dtype

    flat = x.reshape(-1)
    n = flat.shape[0]

    # Pad only when numel % 128 != 0 so data forms a lane-dense (rows, 128)
    # slab.  Not triggered for the example shapes; the mask is index-based and
    # tiling-independent, so results don't depend on this path.
    pad = (-n) % _LANES
    if pad:
        flat = jnp.pad(flat, (0, pad))
    n_rows = (n + pad) // _LANES
    x2d = flat.reshape(n_rows, _LANES)

    # Block selection: big (~8 MiB) lane-dense blocks to amortize per-step
    # overhead; force >= 2 blocks for mid/large tensors so the "parallel"
    # axis can use both TensorCores on v7x.
    elem_bytes = orig_dtype.itemsize
    max_block_rows = max(8, (_MAX_BLOCK_BYTES // (_LANES * elem_bytes)) // 8 * 8)
    if n_rows > max_block_rows:
        block_rows = max_block_rows
    elif n_rows >= _SPLIT_MIN_ROWS:
        block_rows = ((pl.cdiv(n_rows, 2) + 7) // 8) * 8
    else:
        block_rows = n_rows
    grid = (pl.cdiv(n_rows, block_rows),)

    p_arr = jnp.asarray(p, dtype=jnp.float32)
    thr_arr = (
        jnp.clip(jnp.round(p_arr * float(1 << 24)), 0.0, float(1 << 24))
        .astype(jnp.int32)
        .reshape(1)
    )
    scale_arr = (
        jnp.where(p_arr < 1.0, 1.0 / (1.0 - p_arr), 0.0)
        .astype(jnp.float32)
        .reshape(1)
    )
    seed_arr = jnp.asarray(seed, dtype=jnp.int32).reshape(1)

    out2d = pl.pallas_call(
        _dropout_kernel,
        out_shape=jax.ShapeDtypeStruct((n_rows, _LANES), orig_dtype),
        grid=grid,
        in_specs=[
            pl.BlockSpec(memory_space=pltpu.MemorySpace.SMEM),  # seed
            pl.BlockSpec(memory_space=pltpu.MemorySpace.SMEM),  # threshold
            pl.BlockSpec(memory_space=pltpu.MemorySpace.SMEM),  # scale
            pl.BlockSpec((block_rows, _LANES), lambda i: (i, 0)),
        ],
        out_specs=pl.BlockSpec((block_rows, _LANES), lambda i: (i, 0)),
        compiler_params=pltpu.CompilerParams(
            dimension_semantics=("parallel",),
            vmem_limit_bytes=_VMEM_LIMIT_BYTES,
        ),
    )(seed_arr, thr_arr, scale_arr, x2d)

    if pad:
        return out2d.reshape(-1)[:n].reshape(orig_shape)
    return out2d.reshape(orig_shape)


class FixedDropout:
    """JAX/Pallas counterpart of the torch FixedDropout module."""

    def __init__(self, seed: int = 0) -> None:
        self.seed = seed

    def __call__(self, x, p):
        # `p` mirrors the torch module: a callable returning the drop prob.
        p_val = p() if callable(p) else p
        return _fixed_dropout_impl(x, p_val, self.seed)


if __name__ == "__main__":
    key = jax.random.PRNGKey(0)
    x = jax.random.normal(key, (2, 4, 16, 16), dtype=jnp.float32)

    mod = FixedDropout(seed=0)
    p_fn = lambda: 0.5

    out = jax.block_until_ready(mod(x, p_fn))

    # Basic sanity checks (not part of the spec, just self-verification).
    assert out.shape == x.shape and out.dtype == x.dtype
    zero_frac = float(jnp.mean(out == 0.0))
    assert 0.3 < zero_frac < 0.7, f"unexpected drop fraction {zero_frac}"
    # Determinism w.r.t. the fixed seed.
    out2 = jax.block_until_ready(mod(x, p_fn))
    assert bool(jnp.all(out == out2))
    # Kept elements are scaled by exactly 1/(1-p) = 2.0.
    kept = out != 0.0
    assert bool(
        jnp.allclose(
            jnp.where(kept, out, 0.0), jnp.where(kept, x * 2.0, 0.0), atol=1e-5
        )
    )

    # TODO(synk): exact torch.manual_seed RNG bit-stream is not reproducible
    # on TPU; only determinism w.r.t. the fixed seed is preserved.
    print("KERNEL_OK")
</pallas_src>

<mosaic_0001>
module attributes {stable_mosaic.version = 11 : i64} {
  func.func @_dropout_kernel(%arg0: i32, %arg1: memref<1xi32, #tpu.memory_space<smem>>, %arg2: memref<1xi32, #tpu.memory_space<smem>>, %arg3: memref<1xf32, #tpu.memory_space<smem>>, %arg4: memref<16x128xf32, #tpu.memory_space<vmem>>, %arg5: memref<16x128xf32, #tpu.memory_space<vmem>>) attributes {dimension_semantics = [#tpu.dimension_semantics<parallel>], iteration_bounds = array<i64: 1>, scalar_prefetch = 0 : i64, scratch_operands = 0 : i64, tpu.core_type = #tpu.core_type<tc>, window_params = [{transform_indices = @transform_0, window_bounds = array<i64: 1>}, {transform_indices = @transform_1, window_bounds = array<i64: 1>}, {transform_indices = @transform_2, window_bounds = array<i64: 1>}, {transform_indices = @transform_3, window_bounds = array<i64: 16, 128>}, {transform_indices = @transform_4, window_bounds = array<i64: 16, 128>}]} {
    %c16_i32 = arith.constant 16 : i32
    %0 = arith.muli %arg0, %c16_i32 : i32
    %1 = tpu.iota {dimensions = array<i32: 0>} : vector<16x128xi32>
    %2 = vector.broadcast %0 : i32 to vector<16x128xi32>
    %3 = arith.addi %2, %1 : vector<16x128xi32>
    %4 = tpu.iota {dimensions = array<i32: 1>} : vector<16x128xi32>
    %c7_i32 = arith.constant 7 : i32
    %5 = vector.broadcast %c7_i32 : i32 to vector<16x128xi32>
    %6 = arith.shli %3, %5 : vector<16x128xi32>
    %7 = arith.ori %6, %4 : vector<16x128xi32>
    %c0 = arith.constant 0 : index
    %8 = memref.load %arg1[%c0] : memref<1xi32, #tpu.memory_space<smem>>
    %c-1640531527_i32 = arith.constant -1640531527 : i32
    %9 = arith.muli %8, %c-1640531527_i32 : i32
    %10 = vector.broadcast %9 : i32 to vector<16x128xi32>
    %11 = arith.xori %7, %10 : vector<16x128xi32>
    %c2146121005_i32 = arith.constant 2146121005 : i32
    %12 = vector.broadcast %c2146121005_i32 : i32 to vector<16x128xi32>
    %13 = arith.muli %11, %12 : vector<16x128xi32>
    %c15_i32 = arith.constant 15 : i32
    %14 = vector.broadcast %c15_i32 : i32 to vector<16x128xi32>
    %15 = arith.shrui %13, %14 : vector<16x128xi32>
    %16 = arith.xori %13, %15 : vector<16x128xi32>
    %c-2073254261_i32 = arith.constant -2073254261 : i32
    %17 = vector.broadcast %c-2073254261_i32 : i32 to vector<16x128xi32>
    %18 = arith.muli %16, %17 : vector<16x128xi32>
    %c16_i32_0 = arith.constant 16 : i32
    %19 = vector.broadcast %c16_i32_0 : i32 to vector<16x128xi32>
    %20 = arith.shrui %18, %19 : vector<16x128xi32>
    %21 = arith.xori %18, %20 : vector<16x128xi32>
    %c0_1 = arith.constant 0 : index
    %22 = memref.load %arg2[%c0_1] : memref<1xi32, #tpu.memory_space<smem>>
    %c8_i32 = arith.constant 8 : i32
    %23 = vector.broadcast %c8_i32 : i32 to vector<16x128xi32>
    %24 = arith.shrui %21, %23 : vector<16x128xi32>
    %25 = vector.broadcast %22 : i32 to vector<16x128xi32>
    %26 = arith.cmpi uge, %24, %25 : vector<16x128xi32>
    %c0_2 = arith.constant 0 : index
    %c0_3 = arith.constant 0 : index
    %27 = vector.load %arg4[%c0_2, %c0_3] : memref<16x128xf32, #tpu.memory_space<vmem>>, vector<16x128xf32>
    %c0_4 = arith.constant 0 : index
    %28 = memref.load %arg3[%c0_4] : memref<1xf32, #tpu.memory_space<smem>>
    %29 = vector.broadcast %28 : f32 to vector<16x128xf32>
    %30 = arith.mulf %27, %29 : vector<16x128xf32>
    %cst = arith.constant 0.000000e+00 : f32
    %31 = vector.broadcast %cst : f32 to vector<16x128xf32>
    %32 = arith.select %26, %30, %31 : vector<16x128xi1>, vector<16x128xf32>
    %c0_5 = arith.constant 0 : index
    %c0_6 = arith.constant 0 : index
    %33 = vector.load %arg5[%c0_5, %c0_6] : memref<16x128xf32, #tpu.memory_space<vmem>>, vector<16x128xf32>
    tpu.vector_store %arg5[%c0_5, %c0_6], %32 {strides = array<i32>} : memref<16x128xf32, #tpu.memory_space<vmem>>, vector<16x128xf32>,
    return
  }
  func.func @transform_0(%arg0: i32) -> i32 {
    %c0_i32 = arith.constant 0 : i32
    %c0_i32_0 = arith.constant 0 : i32
    return %c0_i32 : i32
  }
  func.func @transform_1(%arg0: i32) -> i32 {
    %c0_i32 = arith.constant 0 : i32
    %c0_i32_0 = arith.constant 0 : i32
    return %c0_i32 : i32
  }
  func.func @transform_2(%arg0: i32) -> i32 {
    %c0_i32 = arith.constant 0 : i32
    %c0_i32_0 = arith.constant 0 : i32
    return %c0_i32 : i32
  }
  func.func @transform_3(%arg0: i32) -> (i32, i32) {
    %c0_i32 = arith.constant 0 : i32
    %c0_i32_0 = arith.constant 0 : i32
    return %arg0, %c0_i32 : i32, i32
  }
  func.func @transform_4(%arg0: i32) -> (i32, i32) {
    %c0_i32 = arith.constant 0 : i32
    %c0_i32_0 = arith.constant 0 : i32
    return %arg0, %c0_i32 : i32, i32
  }
}

</mosaic_0001>

<bundles_post_ra>
// kernel: _fixed_dropout_impl.1
= control target key start
LH: loop header
LB: loop body
LE: loop exit
PB: predicated region body
PF: predicated region fallthrough
CT: control target
= control target key end

     0   :  { %v21_v0 = vlaneseq  ;;  %s116_s0 = inlined_call_operand.<no memory space> [shape: s32[1], index: 0, kind: input, shape index: {}]   ;;  %s117_s2 = inlined_call_operand.<no memory space> [shape: f32[1], index: 2, kind: input, shape index: {}]   ;;  %s118_s3 = inlined_call_operand.vmem [shape: f32[16,128], index: 3, kind: input, shape index: {}]   ;;  %s119_s1 = inlined_call_operand.<no memory space> [shape: s32[1], index: 1, kind: input, shape index: {}]   ;;  %s120_s4 = inlined_call_operand.vmem [shape: f32[16,128], index: 4, kind: output, shape index: {}]  }
   0x1   :  { %s34_s17 = smul.u32 2654435769, %s116_s0  ;;  %v56_v19 = vld [vmem:[%s118_s3] sm:$0xff]  ;;  %v59_v20 = vstv %s117_s2  ;;  %v57_v24 = vld [vmem:[%s118_s3 + $0x8] sm:$0xff]  ;;  %v53_v25 = vstv %s119_s1 }
   0x2   :  { %v22_v1 = vshrl.u32 %v21_v0, 7  ;;  %v28_v2 = vand.u32 127, %v21_v0  ;;  %v60_v26 = vmul.f32 %v59_v20, %v56_v19  ;;  %v61_v29 = vmul.f32 %v59_v20, %v57_v24 }
   0x3   :  { %v35_v5 = vstv %s34_s17 }
   0x4   :  { %v29_v3 = vshll.u32 %v22_v1, 7  ;;  %v23_v4 = vadd.s32 8, %v22_v1 }
   0x6   :  { %v31_v6 = vor.u32 %v29_v3, %v28_v2  ;;  %v30_v7 = vshll.u32 %v23_v4, 7 }
   0x8   :  { %v36_v8 = vxor.u32 %v35_v5, %v31_v6  ;;  %v32_v9 = vor.u32 %v30_v7, %v28_v2 }
   0xa   :  { %v38_v10 = vmul.u32 2146121005, %v36_v8  ;;  %v37_v11 = vxor.u32 %v35_v5, %v32_v9 }
   0xc   :  { %v40_v12 = vshrl.u32 %v38_v10, 15  ;;  %v39_v13 = vmul.u32 2146121005, %v37_v11 }
   0xe   :  { %v42_v14 = vxor.u32 %v40_v12, %v38_v10  ;;  %v41_v15 = vshrl.u32 %v39_v13, 15 }
  0x10   :  { %v44_v16 = vmul.u32 2221713035, %v42_v14  ;;  %v43_v17 = vxor.u32 %v41_v15, %v39_v13 }
  0x12   :  { %v46_v18 = vshrl.u32 %v44_v16, 16  ;;  %v45_v21 = vmul.u32 2221713035, %v43_v17 }
  0x14   :  { %v48_v22 = vxor.u32 %v46_v18, %v44_v16  ;;  %v47_v23 = vshrl.u32 %v45_v21, 16 }
  0x16   :  { %v51_v27 = vshrl.u32 %v48_v22, 8  ;;  %v49_v28 = vxor.u32 %v47_v23, %v45_v21 }
  0x18   :  { %vm54_vm0 = vcmp.ge.u32.totalorder %v51_v27, %v53_v25  ;;  %v52_v30 = vshrl.u32 %v49_v28, 8 }
  0x19   :  { %v62_v31 = vsel %vm54_vm0, %v60_v26, 0.0 }
  0x1a   :  { %64 = vst [vmem:[%s120_s4] sm:$0xff] %v62_v31  ;;  %vm55_vm1 = vcmp.ge.u32.totalorder %v52_v30, %v53_v25 }
  0x1b   :  { %v63_v32 = vsel %vm55_vm1, %v61_v29, 0.0 }
  0x1c   :  { %65 = vst [vmem:[%s120_s4 + $0x8] sm:$0xff] %v63_v32 }

</bundles_post_ra>
